<compile_context>
chip_gen: v7x
topology: tpu7x:2x2x1
jax: 0.10.0
libtpu: 0.0.40
codegen_flags: <defaults>
</compile_context>

<pallas_src>
import functools

import jax
import jax.numpy as jnp
from jax import lax
from jax.experimental import pallas as pl
from jax.experimental.pallas import tpu as pltpu


# ---------------------------------------------------------------------------
# Pallas kernel
# ---------------------------------------------------------------------------
def _manhattan_lstm_kernel(x_ref, h0_ref, c0_ref, w_ih_ref, w_hh_ref, b_ref,
                           out_ref, h_s, c_s, *, hidden_size, t_chunk):
    """Fused dual-branch LSTM recurrence over one time-chunk.

    x_ref   : (t_chunk*B, 2*In)  lane-stacked [x1 | x2] rows, time-major
    h0/c0   : (B, HP)            dual initial state (cols [0:H]=b1, [H:2H]=b2)
    w_ih_ref: (2*In, 4*HP)       block-diagonal, gate blocks 128-lane aligned
    w_hh_ref: (HP, 4*HP)         block-diagonal recurrent weights
    b_ref   : (1, 4*HP)          fused bias (b_ih + b_hh per branch)
    out_ref : (B, 128)           lane-dense similarity output (col 0 is valid)
    h_s/c_s : (B, HP)            VMEM scratch carrying state across grid steps
    """
    HP = h_s.shape[1]                 # padded per-gate block / state width
    B = h_s.shape[0]
    H = hidden_size

    step = pl.program_id(0)

    @pl.when(step == 0)
    def _init():
        h_s[...] = h0_ref[...]
        c_s[...] = c0_ref[...]

    # ---- input projection for the whole chunk: one big MXU matmul that is
    #      OFF the serial dependency chain (both branches at once). ---------
    gx = (jnp.dot(x_ref[...], w_ih_ref[...],
                  preferred_element_type=jnp.float32)
          + b_ref[...])               # (t_chunk*B, 4*HP)

    # hoist loop-invariant recurrent weights / state loads
    w_hh = w_hh_ref[...]
    h = h_s[...]
    c = c_s[...]

    # ---- serial recurrence: one fused (B,HP)@(HP,4*HP) matmul + one set of
    #      activations per step, fully unrolled (static slices). ------------
    for tt in range(t_chunk):
        g = gx[tt * B:(tt + 1) * B, :] + jnp.dot(
            h, w_hh, preferred_element_type=jnp.float32)   # (B, 4*HP)
        i_g = jax.nn.sigmoid(g[:, 0 * HP:1 * HP])   # [i1 i2 pad]
        f_g = jax.nn.sigmoid(g[:, 1 * HP:2 * HP])   # [f1 f2 pad]
        g_g = jnp.tanh(g[:, 2 * HP:3 * HP])         # [g1 g2 pad]
        o_g = jax.nn.sigmoid(g[:, 3 * HP:4 * HP])   # [o1 o2 pad]
        c = f_g * c + i_g * g_g
        h = o_g * jnp.tanh(c)
        # padding columns stay exactly zero: weights/bias are zero there,
        # so c_pad' = 0.5*0 + 0.5*0 = 0 and h_pad' = 0.5*tanh(0) = 0.

    h_s[...] = h
    c_s[...] = c

    @pl.when(step == pl.num_programs(0) - 1)
    def _finalize():
        h1 = h[:, 0:H]
        h2 = h[:, H:2 * H]
        dist = jnp.sum(jnp.abs(h1 - h2), axis=1, keepdims=True)   # (B, 1)
        # lane-dense store; wrapper reads column 0
        out_ref[...] = jnp.broadcast_to(jnp.exp(-dist), out_ref.shape)


# ---------------------------------------------------------------------------
# Wrapper-side parameter packing (one-time, plain XLA)
# ---------------------------------------------------------------------------
def _round_up(x, m):
    return ((x + m - 1) // m) * m


def pack_dual_lstm_params(lstm1, lstm2, hidden_size, input_size):
    """lstm*: (w_ih (4H,In), w_hh (4H,H), b (4H,)) in PyTorch layout, gate
    order [i,f,g,o], b = b_ih + b_hh.  Returns block-diagonal, 128-lane
    aligned fused weights for the dual-branch kernel (exact per-branch
    semantics even if lstm_1 and lstm_2 weights differ)."""
    H, In = hidden_size, input_size
    HP = _round_up(2 * H, 128)
    w_ih_blk = jnp.zeros((2 * In, 4 * HP), jnp.float32)
    w_hh_blk = jnp.zeros((HP, 4 * HP), jnp.float32)
    b_blk = jnp.zeros((1, 4 * HP), jnp.float32)
    for br, (w_ih, w_hh, b) in enumerate((lstm1, lstm2)):
        for gate in range(4):
            col = gate * HP + br * H
            w_ih_blk = w_ih_blk.at[br * In:(br + 1) * In, col:col + H].set(
                w_ih[gate * H:(gate + 1) * H, :].T)
            w_hh_blk = w_hh_blk.at[br * H:(br + 1) * H, col:col + H].set(
                w_hh[gate * H:(gate + 1) * H, :].T)
            b_blk = b_blk.at[0, col:col + H].set(b[gate * H:(gate + 1) * H])
    return w_ih_blk, w_hh_blk, b_blk, HP


# ---------------------------------------------------------------------------
# pallas_call wrapper
# ---------------------------------------------------------------------------
def manhattan_lstm_pallas(emb1, emb2, h0, c0,
                          w_ih_blk, w_hh_blk, b_blk, hp,
                          hidden_size, t_chunk=4):
    """emb1/emb2: (seq, B, In) f32; h0/c0: (B, H) f32; packed fused weights."""
    seq, batch, in_sz = emb1.shape
    H, HP = hidden_size, hp
    assert seq % t_chunk == 0, "seq_len must be a multiple of t_chunk"
    num_chunks = seq // t_chunk
    rows = t_chunk * batch
    assert num_chunks == 1 or rows % 8 == 0, \
        "t_chunk * batch must be a multiple of 8 when time-tiling"

    # lane-stack the two branches' embedded inputs: (seq*B, 2*In)
    x_cat = jnp.concatenate([emb1, emb2], axis=-1).reshape(
        seq * batch, 2 * in_sz)

    # dual (branch-stacked, lane-padded) initial state; the module feeds the
    # SAME (h0, c0) to both LSTMs.
    def dual(s):
        z = jnp.zeros((batch, HP), jnp.float32)
        return z.at[:, 0:H].set(s).at[:, H:2 * H].set(s)

    h0_cat = dual(h0)
    c0_cat = dual(c0)

    kernel = functools.partial(_manhattan_lstm_kernel,
                               hidden_size=H, t_chunk=t_chunk)

    out = pl.pallas_call(
        kernel,
        out_shape=jax.ShapeDtypeStruct((batch, 128), jnp.float32),
        grid=(num_chunks,),
        in_specs=[
            pl.BlockSpec((rows, 2 * in_sz), lambda t: (t, 0)),    # x chunk
            pl.BlockSpec((batch, HP), lambda t: (0, 0)),          # h0 (dual)
            pl.BlockSpec((batch, HP), lambda t: (0, 0)),          # c0 (dual)
            pl.BlockSpec((2 * in_sz, 4 * HP), lambda t: (0, 0)),  # W_ih blk
            pl.BlockSpec((HP, 4 * HP), lambda t: (0, 0)),         # W_hh blk
            pl.BlockSpec((1, 4 * HP), lambda t: (0, 0)),          # bias blk
        ],
        out_specs=pl.BlockSpec((batch, 128), lambda t: (0, 0)),
        scratch_shapes=[
            pltpu.VMEM((batch, HP), jnp.float32),   # fused h state carry
            pltpu.VMEM((batch, HP), jnp.float32),   # fused c state carry
        ],
        compiler_params=pltpu.CompilerParams(
            dimension_semantics=("arbitrary",)),    # time is serial
    )(x_cat, h0_cat, c0_cat, w_ih_blk, w_hh_blk, b_blk)

    return out[:, 0]     # similarity_scores: (batch,)


# ---------------------------------------------------------------------------
# Module-level glue (mirrors Manhattan_LSTM.forward / init_weights)
# ---------------------------------------------------------------------------
def make_params(key, vocab_size, input_size, hidden_size):
    """Xavier-normal LSTM weights, zero biases, lstm_2 identical to lstm_1
    (mirrors Manhattan_LSTM.init_weights)."""
    k_emb, k_ih, k_hh = jax.random.split(key, 3)
    embedding = jax.random.normal(k_emb, (vocab_size, input_size),
                                  dtype=jnp.float32)

    def xavier_normal(k, shape):
        fan_out, fan_in = shape
        std = jnp.sqrt(2.0 / (fan_in + fan_out)).astype(jnp.float32)
        return std * jax.random.normal(k, shape, dtype=jnp.float32)

    # PyTorch shapes: weight_ih (4H, In), weight_hh (4H, H), bias (4H,)
    w_ih = xavier_normal(k_ih, (4 * hidden_size, input_size))
    w_hh = xavier_normal(k_hh, (4 * hidden_size, hidden_size))
    b = jnp.zeros((4 * hidden_size,), dtype=jnp.float32)   # b_ih + b_hh = 0
    lstm1 = (w_ih, w_hh, b)
    lstm2 = (w_ih, w_hh, b)      # lstm_2 copies lstm_1
    return embedding, lstm1, lstm2


def manhattan_lstm_forward(input_pair, hidden, embedding,
                           lstm1, lstm2, hidden_size, t_chunk=4):
    """input_pair: tuple of int32 (seq, batch) token ids (time-major);
    hidden: (h0, c0) each (1, batch, H)."""
    ids1, ids2 = input_pair
    # TODO(synk): embedding lookup is a pure gather; done in plain JAX glue.
    emb1 = embedding[ids1]          # (seq, batch, In)
    emb2 = embedding[ids2]
    h0 = hidden[0][0]               # (batch, H)
    c0 = hidden[1][0]
    input_size = embedding.shape[1]
    w_ih_blk, w_hh_blk, b_blk, hp = pack_dual_lstm_params(
        lstm1, lstm2, hidden_size, input_size)
    return manhattan_lstm_pallas(emb1, emb2, h0, c0,
                                 w_ih_blk, w_hh_blk, b_blk, hp,
                                 hidden_size, t_chunk=t_chunk)


# ---------------------------------------------------------------------------
# Pure-JAX reference (for a correctness self-check)
# ---------------------------------------------------------------------------
def manhattan_lstm_reference(emb1, emb2, h0, c0, lstm1, lstm2):
    def run(emb, params):
        w_ih, w_hh, b = params
        def cell(carry, x_t):
            h, c = carry
            gates = x_t @ w_ih.T + h @ w_hh.T + b
            i, f, g, o = jnp.split(gates, 4, axis=1)
            i = jax.nn.sigmoid(i)
            f = jax.nn.sigmoid(f)
            g = jnp.tanh(g)
            o = jax.nn.sigmoid(o)
            c = f * c + i * g
            h = o * jnp.tanh(c)
            return (h, c), None
        (h, _), _ = lax.scan(cell, (h0, c0), emb)
        return h
    h1 = run(emb1, lstm1)
    h2 = run(emb2, lstm2)
    return jnp.exp(-jnp.sum(jnp.abs(h1 - h2), axis=1))


# ---------------------------------------------------------------------------
if __name__ == "__main__":
    vocab_size = 50
    input_size = 16     # embedding dim
    hidden_size = 32
    seq_len = 8
    batch = 2
    t_chunk = 4         # time tile -> grid=(2,), exercises the h/c carry

    key = jax.random.PRNGKey(0)
    k_params, k_ids1, k_ids2 = jax.random.split(key, 3)

    embedding, lstm1, lstm2 = make_params(
        k_params, vocab_size, input_size, hidden_size)

    ids1 = jax.random.randint(k_ids1, (seq_len, batch), 0, vocab_size,
                              dtype=jnp.int32)
    ids2 = jax.random.randint(k_ids2, (seq_len, batch), 0, vocab_size,
                              dtype=jnp.int32)

    # init_hidden: zeros (h0, c0), each (1, batch, hidden)
    h0 = jnp.zeros((1, batch, hidden_size), dtype=jnp.float32)
    c0 = jnp.zeros((1, batch, hidden_size), dtype=jnp.float32)

    scores = manhattan_lstm_forward((ids1, ids2), (h0, c0), embedding,
                                    lstm1, lstm2, hidden_size,
                                    t_chunk=t_chunk)
    scores = jax.block_until_ready(scores)

    # correctness self-check against a pure-JAX LSTM reference
    ref = manhattan_lstm_reference(embedding[ids1], embedding[ids2],
                                   h0[0], c0[0], lstm1, lstm2)
    ref = jax.block_until_ready(ref)

    assert scores.shape == (batch,)
    assert bool(jnp.all(jnp.isfinite(scores)))
    assert bool(jnp.allclose(scores, ref, atol=1e-4, rtol=1e-4)), (scores, ref)
    print("KERNEL_OK")
</pallas_src>

<mosaic_0001>
module attributes {stable_mosaic.version = 11 : i64} {
  func.func @_manhattan_lstm_kernel(%arg0: i32, %arg1: memref<8x32xf32, #tpu.memory_space<vmem>>, %arg2: memref<2x128xf32, #tpu.memory_space<vmem>>, %arg3: memref<2x128xf32, #tpu.memory_space<vmem>>, %arg4: memref<32x512xf32, #tpu.memory_space<vmem>>, %arg5: memref<128x512xf32, #tpu.memory_space<vmem>>, %arg6: memref<1x512xf32, #tpu.memory_space<vmem>>, %arg7: memref<2x128xf32, #tpu.memory_space<vmem>>, %arg8: memref<2x128xf32, #tpu.memory_space<vmem>>, %arg9: memref<2x128xf32, #tpu.memory_space<vmem>>) attributes {dimension_semantics = [#tpu.dimension_semantics<arbitrary>], iteration_bounds = array<i64: 2>, scalar_prefetch = 0 : i64, scratch_operands = 2 : i64, tpu.core_type = #tpu.core_type<tc>, window_params = [{transform_indices = @transform_0, window_bounds = array<i64: 8, 32>}, {pipeline_mode = #tpu.pipeline_mode<synchronous>, transform_indices = @transform_1, window_bounds = array<i64: 2, 128>}, {pipeline_mode = #tpu.pipeline_mode<synchronous>, transform_indices = @transform_2, window_bounds = array<i64: 2, 128>}, {pipeline_mode = #tpu.pipeline_mode<synchronous>, transform_indices = @transform_3, window_bounds = array<i64: 32, 512>}, {pipeline_mode = #tpu.pipeline_mode<synchronous>, transform_indices = @transform_4, window_bounds = array<i64: 128, 512>}, {pipeline_mode = #tpu.pipeline_mode<synchronous>, transform_indices = @transform_5, window_bounds = array<i64: 1, 512>}, {pipeline_mode = #tpu.pipeline_mode<synchronous>, transform_indices = @transform_6, window_bounds = array<i64: 2, 128>}]} {
    %c0_i32 = arith.constant 0 : i32
    %0 = arith.cmpi eq, %arg0, %c0_i32 : i32
    %1 = arith.extui %0 : i1 to i32
    %c0_i32_0 = arith.constant 0 : i32
    %2 = arith.cmpi ne, %1, %c0_i32_0 : i32
    scf.if %2 {
      %c0_33 = arith.constant 0 : index
      %c0_34 = arith.constant 0 : index
      %129 = vector.load %arg2[%c0_33, %c0_34] : memref<2x128xf32, #tpu.memory_space<vmem>>, vector<2x128xf32>
      %c0_35 = arith.constant 0 : index
      %c0_36 = arith.constant 0 : index
      %130 = vector.load %arg8[%c0_35, %c0_36] : memref<2x128xf32, #tpu.memory_space<vmem>>, vector<2x128xf32>
      tpu.vector_store %arg8[%c0_35, %c0_36], %129 {strides = array<i32>} : memref<2x128xf32, #tpu.memory_space<vmem>>, vector<2x128xf32>,
      %c0_37 = arith.constant 0 : index
      %c0_38 = arith.constant 0 : index
      %131 = vector.load %arg3[%c0_37, %c0_38] : memref<2x128xf32, #tpu.memory_space<vmem>>, vector<2x128xf32>
      %c0_39 = arith.constant 0 : index
      %c0_40 = arith.constant 0 : index
      %132 = vector.load %arg9[%c0_39, %c0_40] : memref<2x128xf32, #tpu.memory_space<vmem>>, vector<2x128xf32>
      tpu.vector_store %arg9[%c0_39, %c0_40], %131 {strides = array<i32>} : memref<2x128xf32, #tpu.memory_space<vmem>>, vector<2x128xf32>,
    } else {
    }
    %c0 = arith.constant 0 : index
    %c0_1 = arith.constant 0 : index
    %3 = vector.load %arg1[%c0, %c0_1] : memref<8x32xf32, #tpu.memory_space<vmem>>, vector<8x32xf32>
    %c0_2 = arith.constant 0 : index
    %c0_3 = arith.constant 0 : index
    %4 = vector.load %arg4[%c0_2, %c0_3] : memref<32x512xf32, #tpu.memory_space<vmem>>, vector<32x512xf32>
    %cst = arith.constant dense<0.000000e+00> : vector<8x512xf32>
    %5 = tpu.matmul %3, %4, %cst {dimension_numbers = #tpu.dot_dimension_numbers<[1], [0], [0], [1], [0, 0, 1, 1], [], []>} : vector<8x32xf32>, vector<32x512xf32>, vector<8x512xf32> -> vector<8x512xf32>
    %c0_4 = arith.constant 0 : index
    %c0_5 = arith.constant 0 : index
    %6 = vector.load %arg6[%c0_4, %c0_5] : memref<1x512xf32, #tpu.memory_space<vmem>>, vector<1x512xf32>
    %7 = vector.broadcast %6 : vector<1x512xf32> to vector<8x512xf32>
    %8 = arith.addf %5, %7 : vector<8x512xf32>
    %c0_6 = arith.constant 0 : index
    %c0_7 = arith.constant 0 : index
    %9 = vector.load %arg5[%c0_6, %c0_7] : memref<128x512xf32, #tpu.memory_space<vmem>>, vector<128x512xf32>
    %c0_8 = arith.constant 0 : index
    %c0_9 = arith.constant 0 : index
    %10 = vector.load %arg8[%c0_8, %c0_9] : memref<2x128xf32, #tpu.memory_space<vmem>>, vector<2x128xf32>
    %c0_10 = arith.constant 0 : index
    %c0_11 = arith.constant 0 : index
    %11 = vector.load %arg9[%c0_10, %c0_11] : memref<2x128xf32, #tpu.memory_space<vmem>>, vector<2x128xf32>
    %12 = vector.extract_strided_slice %8 {offsets = [0, 0], sizes = [2, 512], strides = [1, 1]} : vector<8x512xf32> to vector<2x512xf32>
    %cst_12 = arith.constant dense<0.000000e+00> : vector<2x512xf32>
    %13 = tpu.matmul %10, %9, %cst_12 {dimension_numbers = #tpu.dot_dimension_numbers<[1], [0], [0], [1], [0, 0, 1, 1], [], []>} : vector<2x128xf32>, vector<128x512xf32>, vector<2x512xf32> -> vector<2x512xf32>
    %14 = arith.addf %12, %13 : vector<2x512xf32>
    %15 = vector.extract_strided_slice %14 {offsets = [0, 0], sizes = [2, 128], strides = [1, 1]} : vector<2x512xf32> to vector<2x128xf32>
    %16 = arith.negf %15 : vector<2x128xf32>
    %17 = math.exp %16 : vector<2x128xf32>
    %cst_13 = arith.constant 1.000000e+00 : f32
    %18 = vector.broadcast %cst_13 : f32 to vector<2x128xf32>
    %19 = arith.addf %18, %17 : vector<2x128xf32>
    %20 = arith.divf %18, %19 : vector<2x128xf32>
    %21 = vector.extract_strided_slice %14 {offsets = [0, 128], sizes = [2, 128], strides = [1, 1]} : vector<2x512xf32> to vector<2x128xf32>
    %22 = arith.negf %21 : vector<2x128xf32>
    %23 = math.exp %22 : vector<2x128xf32>
    %cst_14 = arith.constant 1.000000e+00 : f32
    %24 = vector.broadcast %cst_14 : f32 to vector<2x128xf32>
    %25 = arith.addf %24, %23 : vector<2x128xf32>
    %26 = arith.divf %24, %25 : vector<2x128xf32>
    %27 = vector.extract_strided_slice %14 {offsets = [0, 256], sizes = [2, 128], strides = [1, 1]} : vector<2x512xf32> to vector<2x128xf32>
    %28 = math.tanh %27 : vector<2x128xf32>
    %29 = vector.extract_strided_slice %14 {offsets = [0, 384], sizes = [2, 128], strides = [1, 1]} : vector<2x512xf32> to vector<2x128xf32>
    %30 = arith.negf %29 : vector<2x128xf32>
    %31 = math.exp %30 : vector<2x128xf32>
    %cst_15 = arith.constant 1.000000e+00 : f32
    %32 = vector.broadcast %cst_15 : f32 to vector<2x128xf32>
    %33 = arith.addf %32, %31 : vector<2x128xf32>
    %34 = arith.divf %32, %33 : vector<2x128xf32>
    %35 = arith.mulf %26, %11 : vector<2x128xf32>
    %36 = arith.mulf %20, %28 : vector<2x128xf32>
    %37 = arith.addf %35, %36 : vector<2x128xf32>
    %38 = math.tanh %37 : vector<2x128xf32>
    %39 = arith.mulf %34, %38 : vector<2x128xf32>
    %40 = vector.extract_strided_slice %8 {offsets = [2, 0], sizes = [2, 512], strides = [1, 1]} : vector<8x512xf32> to vector<2x512xf32>
    %cst_16 = arith.constant dense<0.000000e+00> : vector<2x512xf32>
    %41 = tpu.matmul %39, %9, %cst_16 {dimension_numbers = #tpu.dot_dimension_numbers<[1], [0], [0], [1], [0, 0, 1, 1], [], []>} : vector<2x128xf32>, vector<128x512xf32>, vector<2x512xf32> -> vector<2x512xf32>
    %42 = arith.addf %40, %41 : vector<2x512xf32>
    %43 = vector.extract_strided_slice %42 {offsets = [0, 0], sizes = [2, 128], strides = [1, 1]} : vector<2x512xf32> to vector<2x128xf32>
    %44 = arith.negf %43 : vector<2x128xf32>
    %45 = math.exp %44 : vector<2x128xf32>
    %cst_17 = arith.constant 1.000000e+00 : f32
    %46 = vector.broadcast %cst_17 : f32 to vector<2x128xf32>
    %47 = arith.addf %46, %45 : vector<2x128xf32>
    %48 = arith.divf %46, %47 : vector<2x128xf32>
    %49 = vector.extract_strided_slice %42 {offsets = [0, 128], sizes = [2, 128], strides = [1, 1]} : vector<2x512xf32> to vector<2x128xf32>
    %50 = arith.negf %49 : vector<2x128xf32>
    %51 = math.exp %50 : vector<2x128xf32>
    %cst_18 = arith.constant 1.000000e+00 : f32
    %52 = vector.broadcast %cst_18 : f32 to vector<2x128xf32>
    %53 = arith.addf %52, %51 : vector<2x128xf32>
    %54 = arith.divf %52, %53 : vector<2x128xf32>
    %55 = vector.extract_strided_slice %42 {offsets = [0, 256], sizes = [2, 128], strides = [1, 1]} : vector<2x512xf32> to vector<2x128xf32>
    %56 = math.tanh %55 : vector<2x128xf32>
    %57 = vector.extract_strided_slice %42 {offsets = [0, 384], sizes = [2, 128], strides = [1, 1]} : vector<2x512xf32> to vector<2x128xf32>
    %58 = arith.negf %57 : vector<2x128xf32>
    %59 = math.exp %58 : vector<2x128xf32>
    %cst_19 = arith.constant 1.000000e+00 : f32
    %60 = vector.broadcast %cst_19 : f32 to vector<2x128xf32>
    %61 = arith.addf %60, %59 : vector<2x128xf32>
    %62 = arith.divf %60, %61 : vector<2x128xf32>
    %63 = arith.mulf %54, %37 : vector<2x128xf32>
    %64 = arith.mulf %48, %56 : vector<2x128xf32>
    %65 = arith.addf %63, %64 : vector<2x128xf32>
    %66 = math.tanh %65 : vector<2x128xf32>
    %67 = arith.mulf %62, %66 : vector<2x128xf32>
    %68 = vector.extract_strided_slice %8 {offsets = [4, 0], sizes = [2, 512], strides = [1, 1]} : vector<8x512xf32> to vector<2x512xf32>
    %cst_20 = arith.constant dense<0.000000e+00> : vector<2x512xf32>
    %69 = tpu.matmul %67, %9, %cst_20 {dimension_numbers = #tpu.dot_dimension_numbers<[1], [0], [0], [1], [0, 0, 1, 1], [], []>} : vector<2x128xf32>, vector<128x512xf32>, vector<2x512xf32> -> vector<2x512xf32>
    %70 = arith.addf %68, %69 : vector<2x512xf32>
    %71 = vector.extract_strided_slice %70 {offsets = [0, 0], sizes = [2, 128], strides = [1, 1]} : vector<2x512xf32> to vector<2x128xf32>
    %72 = arith.negf %71 : vector<2x128xf32>
    %73 = math.exp %72 : vector<2x128xf32>
    %cst_21 = arith.constant 1.000000e+00 : f32
    %74 = vector.broadcast %cst_21 : f32 to vector<2x128xf32>
    %75 = arith.addf %74, %73 : vector<2x128xf32>
    %76 = arith.divf %74, %75 : vector<2x128xf32>
    %77 = vector.extract_strided_slice %70 {offsets = [0, 128], sizes = [2, 128], strides = [1, 1]} : vector<2x512xf32> to vector<2x128xf32>
    %78 = arith.negf %77 : vector<2x128xf32>
    %79 = math.exp %78 : vector<2x128xf32>
    %cst_22 = arith.constant 1.000000e+00 : f32
    %80 = vector.broadcast %cst_22 : f32 to vector<2x128xf32>
    %81 = arith.addf %80, %79 : vector<2x128xf32>
    %82 = arith.divf %80, %81 : vector<2x128xf32>
    %83 = vector.extract_strided_slice %70 {offsets = [0, 256], sizes = [2, 128], strides = [1, 1]} : vector<2x512xf32> to vector<2x128xf32>
    %84 = math.tanh %83 : vector<2x128xf32>
    %85 = vector.extract_strided_slice %70 {offsets = [0, 384], sizes = [2, 128], strides = [1, 1]} : vector<2x512xf32> to vector<2x128xf32>
    %86 = arith.negf %85 : vector<2x128xf32>
    %87 = math.exp %86 : vector<2x128xf32>
    %cst_23 = arith.constant 1.000000e+00 : f32
    %88 = vector.broadcast %cst_23 : f32 to vector<2x128xf32>
    %89 = arith.addf %88, %87 : vector<2x128xf32>
    %90 = arith.divf %88, %89 : vector<2x128xf32>
    %91 = arith.mulf %82, %65 : vector<2x128xf32>
    %92 = arith.mulf %76, %84 : vector<2x128xf32>
    %93 = arith.addf %91, %92 : vector<2x128xf32>
    %94 = math.tanh %93 : vector<2x128xf32>
    %95 = arith.mulf %90, %94 : vector<2x128xf32>
    %96 = vector.extract_strided_slice %8 {offsets = [6, 0], sizes = [2, 512], strides = [1, 1]} : vector<8x512xf32> to vector<2x512xf32>
    %cst_24 = arith.constant dense<0.000000e+00> : vector<2x512xf32>
    %97 = tpu.matmul %95, %9, %cst_24 {dimension_numbers = #tpu.dot_dimension_numbers<[1], [0], [0], [1], [0, 0, 1, 1], [], []>} : vector<2x128xf32>, vector<128x512xf32>, vector<2x512xf32> -> vector<2x512xf32>
    %98 = arith.addf %96, %97 : vector<2x512xf32>
    %99 = vector.extract_strided_slice %98 {offsets = [0, 0], sizes = [2, 128], strides = [1, 1]} : vector<2x512xf32> to vector<2x128xf32>
    %100 = arith.negf %99 : vector<2x128xf32>
    %101 = math.exp %100 : vector<2x128xf32>
    %cst_25 = arith.constant 1.000000e+00 : f32
    %102 = vector.broadcast %cst_25 : f32 to vector<2x128xf32>
    %103 = arith.addf %102, %101 : vector<2x128xf32>
    %104 = arith.divf %102, %103 : vector<2x128xf32>
    %105 = vector.extract_strided_slice %98 {offsets = [0, 128], sizes = [2, 128], strides = [1, 1]} : vector<2x512xf32> to vector<2x128xf32>
    %106 = arith.negf %105 : vector<2x128xf32>
    %107 = math.exp %106 : vector<2x128xf32>
    %cst_26 = arith.constant 1.000000e+00 : f32
    %108 = vector.broadcast %cst_26 : f32 to vector<2x128xf32>
    %109 = arith.addf %108, %107 : vector<2x128xf32>
    %110 = arith.divf %108, %109 : vector<2x128xf32>
    %111 = vector.extract_strided_slice %98 {offsets = [0, 256], sizes = [2, 128], strides = [1, 1]} : vector<2x512xf32> to vector<2x128xf32>
    %112 = math.tanh %111 : vector<2x128xf32>
    %113 = vector.extract_strided_slice %98 {offsets = [0, 384], sizes = [2, 128], strides = [1, 1]} : vector<2x512xf32> to vector<2x128xf32>
    %114 = arith.negf %113 : vector<2x128xf32>
    %115 = math.exp %114 : vector<2x128xf32>
    %cst_27 = arith.constant 1.000000e+00 : f32
    %116 = vector.broadcast %cst_27 : f32 to vector<2x128xf32>
    %117 = arith.addf %116, %115 : vector<2x128xf32>
    %118 = arith.divf %116, %117 : vector<2x128xf32>
    %119 = arith.mulf %110, %93 : vector<2x128xf32>
    %120 = arith.mulf %104, %112 : vector<2x128xf32>
    %121 = arith.addf %119, %120 : vector<2x128xf32>
    %122 = math.tanh %121 : vector<2x128xf32>
    %123 = arith.mulf %118, %122 : vector<2x128xf32>
    %c0_28 = arith.constant 0 : index
    %c0_29 = arith.constant 0 : index
    %124 = vector.load %arg8[%c0_28, %c0_29] : memref<2x128xf32, #tpu.memory_space<vmem>>, vector<2x128xf32>
    tpu.vector_store %arg8[%c0_28, %c0_29], %123 {strides = array<i32>} : memref<2x128xf32, #tpu.memory_space<vmem>>, vector<2x128xf32>,
    %c0_30 = arith.constant 0 : index
    %c0_31 = arith.constant 0 : index
    %125 = vector.load %arg9[%c0_30, %c0_31] : memref<2x128xf32, #tpu.memory_space<vmem>>, vector<2x128xf32>
    tpu.vector_store %arg9[%c0_30, %c0_31], %121 {strides = array<i32>} : memref<2x128xf32, #tpu.memory_space<vmem>>, vector<2x128xf32>,
    %c1_i32 = arith.constant 1 : i32
    %126 = arith.cmpi eq, %arg0, %c1_i32 : i32
    %127 = arith.extui %126 : i1 to i32
    %c0_i32_32 = arith.constant 0 : i32
    %128 = arith.cmpi ne, %127, %c0_i32_32 : i32
    scf.if %128 {
      %129 = vector.extract_strided_slice %123 {offsets = [0, 0], sizes = [2, 32], strides = [1, 1]} : vector<2x128xf32> to vector<2x32xf32>
      %130 = vector.extract_strided_slice %123 {offsets = [0, 32], sizes = [2, 32], strides = [1, 1]} : vector<2x128xf32> to vector<2x32xf32>
      %131 = arith.subf %129, %130 : vector<2x32xf32>
      %132 = math.absf %131 : vector<2x32xf32>
      %cst_33 = arith.constant dense<0.000000e+00> : vector<2xf32>
      %133 = vector.multi_reduction <add>, %132, %cst_33 [1] : vector<2x32xf32> to vector<2xf32>
      %134 = vector.shape_cast %133 : vector<2xf32> to vector<2x1xf32>
      %cst_34 = arith.constant 0.000000e+00 : f32
      %135 = vector.broadcast %cst_34 : f32 to vector<2x1xf32>
      %136 = arith.subf %135, %134 : vector<2x1xf32>
      %137 = math.exp %136 : vector<2x1xf32>
      %138 = vector.shape_cast %137 : vector<2x1xf32> to vector<2x1xf32>
      %139 = vector.broadcast %138 : vector<2x1xf32> to vector<2x128xf32>
      %c0_35 = arith.constant 0 : index
      %c0_36 = arith.constant 0 : index
      %140 = vector.load %arg7[%c0_35, %c0_36] : memref<2x128xf32, #tpu.memory_space<vmem>>, vector<2x128xf32>
      tpu.vector_store %arg7[%c0_35, %c0_36], %139 {strides = array<i32>} : memref<2x128xf32, #tpu.memory_space<vmem>>, vector<2x128xf32>,
    } else {
    }
    return
  }
  func.func @transform_0(%arg0: i32) -> (i32, i32) {
    %c0_i32 = arith.constant 0 : i32
    %c0_i32_0 = arith.constant 0 : i32
    return %arg0, %c0_i32 : i32, i32
  }
  func.func @transform_1(%arg0: i32) -> (i32, i32) {
    %c0_i32 = arith.constant 0 : i32
    %c0_i32_0 = arith.constant 0 : i32
    %c0_i32_1 = arith.constant 0 : i32
    return %c0_i32, %c0_i32_0 : i32, i32
  }
  func.func @transform_2(%arg0: i32) -> (i32, i32) {
    %c0_i32 = arith.constant 0 : i32
    %c0_i32_0 = arith.constant 0 : i32
    %c0_i32_1 = arith.constant 0 : i32
    return %c0_i32, %c0_i32_0 : i32, i32
  }
  func.func @transform_3(%arg0: i32) -> (i32, i32) {
    %c0_i32 = arith.constant 0 : i32
    %c0_i32_0 = arith.constant 0 : i32
    %c0_i32_1 = arith.constant 0 : i32
    return %c0_i32, %c0_i32_0 : i32, i32
  }
  func.func @transform_4(%arg0: i32) -> (i32, i32) {
    %c0_i32 = arith.constant 0 : i32
    %c0_i32_0 = arith.constant 0 : i32
    %c0_i32_1 = arith.constant 0 : i32
    return %c0_i32, %c0_i32_0 : i32, i32
  }
  func.func @transform_5(%arg0: i32) -> (i32, i32) {
    %c0_i32 = arith.constant 0 : i32
    %c0_i32_0 = arith.constant 0 : i32
    %c0_i32_1 = arith.constant 0 : i32
    return %c0_i32, %c0_i32_0 : i32, i32
  }
  func.func @transform_6(%arg0: i32) -> (i32, i32) {
    %c0_i32 = arith.constant 0 : i32
    %c0_i32_0 = arith.constant 0 : i32
    %c0_i32_1 = arith.constant 0 : i32
    return %c0_i32, %c0_i32_0 : i32, i32
  }
}

</mosaic_0001>

<bundles_post_ra>
// kernel: tpu_custom_call.1
= control target key start
LH: loop header
LB: loop body
LE: loop exit
PB: predicated region body
PF: predicated region fallthrough
CT: control target
= control target key end

     0   :  { %11 = vsyncpa [#allocation5], 0  ;;  %s2543_s0 = inlined_call_operand.hbm [shape: f32[16,32], index: 0, kind: input, shape index: {}]   ;;  %s2544_s1 = inlined_call_operand.vmem [shape: f32[2,128], index: 1, kind: input, shape index: {}]   ;;  %s2545_s2 = inlined_call_operand.hbm [shape: f32[2,128], index: 2, kind: input, shape index: {}]   ;;  %s2546_s3 = inlined_call_operand.hbm [shape: f32[32,512], index: 3, kind: input, shape index: {}]   ;;  %s2547_s4 = inlined_call_operand.hbm [shape: f32[128,512], index: 4, kind: input, shape index: {}]   ;;  %s2548_s5 = inlined_call_operand.vmem [shape: f32[1,512], index: 5, kind: input, shape index: {}]   ;;  %s2549_s6 = inlined_call_operand.hbm [shape: f32[2,128], index: 6, kind: output, shape index: {}]  }
   0x1   :  { %13 = vsyncpa [#allocation5 + $0x1], 0 }
   0x2   :  { %14 = vsyncpa [#allocation8], 0 }
   0x3   :  { %15 = vsyncpa [#allocation11], 0 }
   0x4   :  { %16 = vsyncpa [#allocation6], 0  ;;  %s2077_s21 = smov 0   ;;  %s2079_s22 = smov 0  }
   0x5   :  { %s2081_s23 = smov 0   ;;  %s2083_s24 = smov 0  }
   0x6 LB: > { %s2096_s25 = sadd.s32 4294967295, %s2031_s24   ;;  %p42_p0 = scmp.ne.s32.totalorder %s2023_s22, %s2019_s21  ;;  %s2031_s24 = sphi %s2083_s24, %s2568_s24   ;;  %s2027_s23 = sphi %s2081_s23, %s2567_s23   ;;  %s2023_s22 = sphi %s2079_s22, %s2566_s22   ;;  %s2019_s21 = sphi %s2077_s21, %s2565_s21  }
   0x7   : > { %p2550_p1 = scmp.eq.s32.totalorder %s2096_s25, 0  ;;  %p1394_p2 = scmp.ge.s32.totalorder %s2031_s24, 1 }
   0x8   : > { %p179_p3 = scmp.lt.s32.totalorder %s2031_s24, 3  ;;  %s2033_s28 = smov [#allocation7]  }
   0x9   : > { %p2105_p5 = por %p2550_p1, %p42_p0  ;;  %s195_s29 = sshll.u32 %s2033_s28, 4  ;;  %s196_s29 = int_to_ptr.vmem [resolvable:$true] %s195_s29 }
   0xa   : > { %p2109_p6 = pnand %p1394_p2, %p179_p3  ;;  %s2034_s30 = smov [#allocation9]  }
   0xb   : > { %s2553_s26 = scalar_select %p2105_p5, 1, 0 }
   0xc   : > { %s2554_s27 = scalar_select %p2109_p6, 1, 0 }
   0xd   : > { %p1716_p7 = pneg %p2109_p6  ;;  %s205_s7 = sshll.u32 %s2034_s30, 4  ;;  %s2121_s7 = int_to_ptr.vmem [resolvable:$true] %s205_s7 }
   0xe   : > { %s2035_s9 = smov [#allocation10]   ;;  %s1845_s13 = scalar_lea.hbm %s2545_s2, 32 }
   0xf   : > { %p2117_p8 = pnand %p1716_p7, %p2550_p1  ;;  %s2123_s10 = sshll.u32 %s2035_s9, 4  ;;  %s219_s10 = int_to_ptr.vmem [resolvable:$true] %s2123_s10 }
  0x10   : > { %p1846_p9 = scmp.ne.s32.totalorder %s2545_s2, %s1845_s13  ;;  %p1852_p13 = scmp.lt.u32.totalorder %s1845_s13, %s2545_s2 }
  0x11   : > { %p2133_p10 = pneg %p2117_p8 }
  0x13   : > { %p1848_p11 = pnand %p2133_p10, %p1846_p9 }
  0x15   : > { %p1849_p12 = pneg %p1848_p11 }
  0x17   : > { %p1854_p0 = pnand %p1852_p13, %p1849_p12 }
  0x19   : > { %1857 = shalt.err (!%p1854_p0)
}
  0x1a   : > { %s1858_s19 = scalar_lea.vmem %s196_s29, 32  ;;  %p1866_p4 = scmp.lt.s32.totalorder %s196_s29, %s196_s29 }
  0x1b   : > { %p1859_p2 = scmp.ne.s32.totalorder %s196_s29, %s1858_s19  ;;  %p1867_p1 = scmp.lt.s32.totalorder %s1858_s19, %s1858_s19 }
  0x1d   : > { %p1861_p3 = pnand %p1859_p2, %p2133_p10  ;;  %p1868_p5 = por %p1867_p1, %p1866_p4 }
  0x1f   : > { %p1862_p7 = pneg %p1861_p3 }
  0x21   : > { %p1869_p6 = pnand %p1868_p5, %p1862_p7 }
  0x23   : > { %1872 = shalt.err (!%p1869_p6)
}
  0x24   : > { %1719 = dma.hbm_to_vmem [thread:$0]  (!%p2117_p8), %s2545_s2, 32, %s196_s29, [#allocation8]  }
  0x25   : > { %s1873_s9 = scalar_lea.hbm %s2546_s3, 2048 }
  0x26   : > { %p1874_p9 = scmp.ne.s32.totalorder %s2546_s3, %s1873_s9  ;;  %p1880_p4 = scmp.lt.u32.totalorder %s1873_s9, %s2546_s3 }
  0x28   : > { %p1876_p11 = pnand %p1874_p9, %p2133_p10 }
  0x2a   : > { %p1877_p1 = pneg %p1876_p11 }
  0x2c   : > { %p1882_p5 = pnand %p1880_p4, %p1877_p1 }
  0x2e   : > { %1885 = shalt.err (!%p1882_p5)
}
  0x2f   : > { %s1886_s29 = scalar_lea.vmem %s2121_s7, 2048  ;;  %p1894_p0 = scmp.lt.s32.totalorder %s2121_s7, %s2121_s7 }
  0x30   : > { %p1887_p6 = scmp.ne.s32.totalorder %s2121_s7, %s1886_s29  ;;  %p1895_p2 = scmp.lt.s32.totalorder %s1886_s29, %s1886_s29 }
  0x32   : > { %p1889_p12 = pnand %p1887_p6, %p2133_p10  ;;  %p1896_p3 = por %p1895_p2, %p1894_p0 }
  0x34   : > { %p1890_p13 = pneg %p1889_p12 }
  0x36   : > { %p1897_p7 = pnand %p1896_p3, %p1890_p13 }
  0x38   : > { %1900 = shalt.err (!%p1897_p7)
}
  0x39   : > { %s2036_s15 = smov 512   ;;  %s2037_s17 = smov 32  }
  0x3a   : > { %1722 = dma.hbm_to_vmem [thread:$0]  (!%p2117_p8), %s2546_s3, 2048, %s2121_s7, [#allocation8], %s2036_s15, %s2036_s15, %s2037_s17  }
  0x3b   : > { %s1901_s28 = scalar_lea.hbm %s2547_s4, 8192 }
  0x3c   : > { %p1902_p9 = scmp.ne.s32.totalorder %s2547_s4, %s1901_s28  ;;  %p1908_p4 = scmp.lt.u32.totalorder %s1901_s28, %s2547_s4 }
  0x3e   : > { %p1904_p11 = pnand %p1902_p9, %p2133_p10 }
  0x40   : > { %p1905_p1 = pneg %p1904_p11 }
  0x42   : > { %p1910_p5 = pnand %p1908_p4, %p1905_p1 }
  0x44   : > { %1913 = shalt.err (!%p1910_p5)
}
  0x45   : > { %s1914_s13 = scalar_lea.vmem %s219_s10, 8192  ;;  %p1922_p0 = scmp.lt.s32.totalorder %s219_s10, %s219_s10 }
  0x46   : > { %p1915_p6 = scmp.ne.s32.totalorder %s219_s10, %s1914_s13  ;;  %p1923_p2 = scmp.lt.s32.totalorder %s1914_s13, %s1914_s13 }
  0x48   : > { %p1917_p12 = pnand %p1915_p6, %p2133_p10  ;;  %p1924_p3 = por %p1923_p2, %p1922_p0 }
  0x4a   : > { %p1918_p13 = pneg %p1917_p12 }
  0x4c   : > { %p1925_p7 = pnand %p1924_p3, %p1918_p13 }
  0x4e   : > { %1928 = shalt.err (!%p1925_p7)
}
  0x4f   : > { %1725 = dma.hbm_to_vmem [thread:$0]  (!%p2117_p8), %s2547_s4, 8192, %s219_s10, [#allocation11], %s2036_s15, %s2036_s15, %s2037_s17  }
  0x50   : > { %s2192_s16 = sadd.s32 1, %s2031_s24   ;;  %s29_s18 = sadd.s32 1, %s2027_s23 }
  0x51   : > { %s26_s29 = ssub.s32 %s2031_s24, %s2192_s16  ;;  %p36_p9 = scmp.ne.s32.totalorder %s2027_s23, %s2023_s22 }
  0x52   : > { %p27_p10 = scmp.eq.s32.totalorder %s26_s29, 0  ;;  %p37_p11 = scmp.eq.s32.totalorder %s2031_s24, 0 }
  0x53   : > { %p1733_p1 = scmp.lt.s32.totalorder %s2031_s24, 2  ;;  %s235_s19 = sand.u32 1, %s2027_s23  }
  0x54   : > { %s2202_s8 = scalar_select %p27_p10, %s2027_s23, %s29_s18  }
  0x55   : > { %p38_p4 = por %p37_p11, %p36_p9  ;;  %s1399_s20 = sshll.u32 %s235_s19, 3 }
  0x56   : > { %s1400_s21 = sshll.u32 %s2031_s24, 7  ;;  %s239_s10 = scalar_lea.vmem [#allocation4], %s1399_s20 }
  0x57   : > { %s2209_s9 = scalar_lea.hbm %s2543_s0, %s1400_s21  ;;  %s246_s15 = sshll.u32 %s239_s10, 4  ;;  %s2211_s15 = int_to_ptr.vmem [resolvable:$true] %s246_s15 }
  0x58   : > { %p2213_p8 = pnand %p1733_p1, %p38_p4  ;;  %s236_s24 = scalar_lea.sflag [#allocation5], %s235_s19 }
  0x59   : > { %s1929_s11 = scalar_lea.hbm %s2209_s9, 128  ;;  %s1934_s7 = scalar_lea.hbm %s2543_s0, 256 }
  0x5a   : > { %p1930_p5 = scmp.ne.s32.totalorder %s2209_s9, %s1929_s11  ;;  %p1931_p6 = pneg %p2213_p8 }
  0x5b   : > { %p1935_p0 = scmp.lt.u32.totalorder %s2209_s9, %s2543_s0  ;;  %p1936_p2 = scmp.lt.u32.totalorder %s1934_s7, %s1929_s11 }
  0x5c   : > { %p1932_p12 = pnand %p1931_p6, %p1930_p5  ;;  %p1938_p7 = scmp.lt.u32.totalorder %s1929_s11, %s2209_s9 }
  0x5d   : > { %p1937_p3 = por %p1936_p2, %p1935_p0 }
  0x5e   : > { %p1933_p13 = pneg %p1932_p12 }
  0x5f   : > { %p1939_p10 = por %p1938_p7, %p1937_p3 }
  0x61   : > { %p1940_p9 = pnand %p1939_p10, %p1933_p13 }
  0x63   : > { %1943 = shalt.err (!%p1940_p9)
}
  0x64   : > { %s1944_s18 = scalar_lea.vmem %s2211_s15, 128  ;;  %s2038_s19 = smov [#allocation4]  }
  0x65   : > { %p1945_p11 = scmp.ne.s32.totalorder %s2211_s15, %s1944_s18  ;;  %s1949_s20 = sshll.u32 %s2038_s19, 4  ;;  %s1950_s20 = int_to_ptr.vmem [resolvable:$false] %s1949_s20 }
  0x66   : > { %s1951_s21 = scalar_lea.vmem %s1950_s20, 256  ;;  %p1952_p5 = scmp.lt.s32.totalorder %s2211_s15, %s1950_s20 }
  0x67   : > { %p1947_p1 = pnand %p1945_p11, %p1931_p6  ;;  %p1953_p12 = scmp.lt.s32.totalorder %s1951_s21, %s1944_s18 }
  0x69   : > { %p1948_p4 = pneg %p1947_p1  ;;  %p1954_p0 = por %p1953_p12, %p1952_p5 }
  0x6b   : > { %p1955_p2 = pnand %p1954_p0, %p1948_p4 }
  0x6d   : > { %1958 = shalt.err (!%p1955_p2)
}
  0x6e   : > { %1729 = dma.hbm_to_vmem [thread:$0]  (!%p2213_p8), %s2209_s9, 128, %s2211_s15, %s236_s24  }
  0x6f   : > { %p2558_p13 = scmp.ne.s32.totalorder %s2554_s27, 0 }
  0x70   : > { %s257_s28 = sand.u32 (!%p2558_p13), 1, %s2023_s22   ;;  %p2559_p6 = scmp.ne.s32.totalorder (!%p2558_p13), %s2553_s26, 0 }
  0x71   : > { %255 = sbr.rel (%p2558_p13) target bundleno = 1525 (0x5f5), region = 44  ;;  %s2245_s30 = sshll.u32 (!%p2558_p13), %s257_s28, 3 }
  0x72   : > { %s258_s10 = scalar_lea.sflag (!%p2558_p13), [#allocation5], %s257_s28  ;;  %s261_s11 = scalar_lea.vmem (!%p2558_p13), [#allocation4], %s2245_s30 }
  0x78   : > { %2002 = dma.done.wait (%p2559_p6), %s258_s10, 128  }
  0x79   : > { %2004 = vsyncadd (%p2559_p6), %s258_s10, 4294967168  ;;  %p2560_p3 = scmp.eq.s32.totalorder %s2096_s25, 0 }
  0x7b   : > { %2006 = dma.done.wait (%p2560_p3), [#allocation8], 2080   ;;  %p2561_p8 = pmov %p2560_p3 }
  0x7c   : > { %p2562_p7 = pmov %p2560_p3 }
  0x7d   : > { %2008 = vsyncadd (%p2561_p8), [#allocation8], 4294965216 }
  0x7e   : > { %2010 = dma.done.wait (%p2562_p7), [#allocation11], 8192   ;;  %p2563_p10 = pmov %p2560_p3 }
  0x7f   : > { %p2564_p9 = scmp.ne.s32.totalorder %s2096_s25, 0 }
  0x80   : > { %2012 = vsyncadd (%p2563_p10), [#allocation11], 4294959104  ;;  %v301_v0 = vld [vmem:[%s2544_s1] sm:$0x3] (!%p2564_p9)  ;;  %v303_v1 = vld [vmem:[#allocation7] sm:$0x3] (!%p2564_p9) }
  0x81   : > { %300 = sbr.rel (%p2564_p9) target bundleno = 136 (0x88), region = 64  ;;  %302 = vst [vmem:[#allocation2] sm:$0x3] (!%p2564_p9), %v301_v0  ;;  %304 = vst [vmem:[#allocation3] sm:$0x3] (!%p2564_p9), %v303_v1 }
  0x88 PF: > { %v307_v2 = vld [vmem:[#allocation9 + $0x8] sm:$0xff]  ;;  %v309_v4 = vld [vmem:[#allocation9 + $0x18] sm:$0xff]  ;;  %v306_v7 = vld [vmem:[#allocation9] sm:$0xff]  ;;  %v2039_v9 = vmov 0.0   ;;  %vm344_vm0 = vcmask 261120   ;;  %p1421_p11 = scmp.ne.s32.totalorder %s2096_s25, 1 }
  0x89   : > { %v311_v3 = vld [vmem:[#allocation9 + $0x28] sm:$0xff]  ;;  %v313_v6 = vld [vmem:[#allocation9 + $0x38] sm:$0xff]  ;;  %v310_v8 = vld [vmem:[#allocation9 + $0x20] sm:$0xff]  ;;  %412 = vmatprep.mubr.f32.mxu0 %v2039_v9  ;;  %483 = vmatprep.mubr.f32.mxu1 %v2039_v9  ;;  %s2040_s17 = smov (!%p1421_p11), 96   ;;  %vm1299_vm1 = vcmask (!%p1421_p11), 261126  }
  0x8a   : > { %v1426_v5 = vpack.c.bf16 %v311_v3, %v307_v2  ;;  %v1434_v10 = vpack.c.bf16 %v313_v6, %v309_v4  ;;  %v1428_v11 = vpack.c.bf16 %v310_v8, %v306_v7  ;;  %v308_v12 = vld [vmem:[#allocation9 + $0x10] sm:$0xff]  ;;  %v315_v14 = vld [vmem:[#allocation9 + $0x48] sm:$0xff]  ;;  %v317_v17 = vld [vmem:[#allocation9 + $0x58] sm:$0xff] }
  0x8b   : > { %v312_v13 = vld [vmem:[#allocation9 + $0x30] sm:$0xff]  ;;  %v319_v16 = vld [vmem:[#allocation9 + $0x68] sm:$0xff]  ;;  %v321_v18 = vld [vmem:[#allocation9 + $0x78] sm:$0xff] }
  0x8c   : > { %1427 = vmatprep.subr.bf16.mxu0 %v1426_v5  ;;  %v1436_v15 = vpack.c.bf16 %v312_v13, %v308_v12  ;;  %1435 = vmatprep.subr.bf16.mxu1 %v1434_v10  ;;  %v1430_v19 = vpack.c.bf16 %v319_v16, %v315_v14  ;;  %v1438_v20 = vpack.c.bf16 %v321_v18, %v317_v17  ;;  %v314_v21 = vld [vmem:[#allocation9 + $0x40] sm:$0xff]  ;;  %v316_v23 = vld [vmem:[#allocation9 + $0x50] sm:$0xff]  ;;  %v491_v26 = vld [vmem:[#allocation10 + $0x8] sm:$0xff] }
  0x8d   : > { %1429 = vmatpush1.bf16.msra.mxu0 %v1428_v11  ;;  %v318_v22 = vld [vmem:[#allocation9 + $0x60] sm:$0xff]  ;;  %v320_v25 = vld [vmem:[#allocation9 + $0x70] sm:$0xff]  ;;  %v495_v29 = vld [vmem:[#allocation10 + $0x28] sm:$0xff] }
  0x8e   : > { %1437 = vmatpush1.bf16.msra.mxu1 %v1436_v15  ;;  %v1432_v24 = vpack.c.bf16 %v318_v22, %v314_v21  ;;  %1431 = vmatprep.subr.bf16.mxu0 %v1430_v19  ;;  %v1440_v27 = vpack.c.bf16 %v320_v25, %v316_v23  ;;  %v305_v28 = vld [vmem:[%s261_s11] sm:$0xff]  ;;  %v2269_v32 = vpack.c.bf16 %v495_v29, %v491_v26  ;;  %v490_v34 = vld [vmem:[#allocation10] sm:$0xff] }
  0x8f   : > { %1439 = vmatprep.subr.bf16.mxu1 %v1438_v20  ;;  %v493_v30 = vld [vmem:[#allocation10 + $0x18] sm:$0xff]  ;;  %v494_v35 = vld [vmem:[#allocation10 + $0x20] sm:$0xff]  ;;  %v492_v36 = vld [vmem:[#allocation10 + $0x10] sm:$0xff] }
  0x90   : > { %v497_v31 = vld [vmem:[#allocation10 + $0x38] sm:$0xff]  ;;  %v2273_v37 = vpack.c.bf16 %v494_v35, %v490_v34  ;;  %v496_v38 = vld [vmem:[#allocation10 + $0x30] sm:$0xff]  ;;  %v499_v39 = vld [vmem:[#allocation10 + $0x48] sm:$0xff] }
  0x91   : > { %v2271_v33 = vpack.c.bf16 %v497_v31, %v493_v30  ;;  %1433 = vmatpush1.bf16.msra.mxu0 %v1432_v24  ;;  %v503_v40 = vld [vmem:[#allocation10 + $0x68] sm:$0xff]  ;;  %v2276_v41 = vpack.c.bf16 %v496_v38, %v492_v36  ;;  %v501_v43 = vld [vmem:[#allocation10 + $0x58] sm:$0xff]  ;;  %v498_v45 = vld [vmem:[#allocation10 + $0x40] sm:$0xff] }
  0x92   : > { %1441 = vmatpush1.bf16.msra.mxu1 %v1440_v27  ;;  %1443 = vmatprep.subr.bf16.mxu0 %v2269_v32  ;;  %v2278_v42 = vpack.c.bf16 %v503_v40, %v499_v39  ;;  %v505_v44 = vld [vmem:[#allocation10 + $0x78] sm:$0xff]  ;;  %v502_v47 = vld [vmem:[#allocation10 + $0x60] sm:$0xff]  ;;  %v500_v48 = vld [vmem:[#allocation10 + $0x50] sm:$0xff] }
  0x93   : > { %1475 = vmatprep.subr.bf16.mxu1 %v2271_v33  ;;  %v2281_v46 = vpack.c.bf16 %v505_v44, %v501_v43  ;;  %v504_v49 = vld [vmem:[#allocation10 + $0x70] sm:$0xff]  ;;  %v507_v50 = vld [vmem:[#allocation10 + $0x88] sm:$0xff]  ;;  %v509_v52 = vld [vmem:[#allocation10 + $0x98] sm:$0xff]  ;;  %v2286_v53 = vpack.c.bf16 %v502_v47, %v498_v45 }
  0x94   : > { %1407 = vmatmul.mubr.msk.f32.vlgmr.msra.gmra.mrb[0].mxu0 %vm344_vm0, %v305_v28  ;;  %v511_v51 = vld [vmem:[#allocation10 + $0xa8] sm:$0xff]  ;;  %v513_v54 = vld [vmem:[#allocation10 + $0xb8] sm:$0xff]  ;;  %v2290_v55 = vpack.c.bf16 %v504_v49, %v500_v48  ;;  %v506_v57 = vld [vmem:[#allocation10 + $0x80] sm:$0xff] }
  0x95   : > { %1408 = vmatmul.mubr.msk.f32.vlgmr.msra.gmra.mrb[0].mxu1 %vm344_vm0, %v305_v28  ;;  %1445 = vmatpush1.bf16.msra.mxu0 %v2273_v37  ;;  %v2292_v56 = vpack.c.bf16 %v511_v51, %v507_v50  ;;  %v510_v58 = vld [vmem:[#allocation10 + $0xa0] sm:$0xff]  ;;  %v508_v59 = vld [vmem:[#allocation10 + $0x90] sm:$0xff]  ;;  %v2295_v60 = vpack.c.bf16 %v513_v54, %v509_v52  ;;  %v515_v62 = vld [vmem:[#allocation10 + $0xc8] sm:$0xff] }
  0x96   : > { %1477 = vmatpush1.bf16.msra.mxu1 %v2276_v41  ;;  %1447 = vmatprep.subr.bf16.mxu0 %v2278_v42  ;;  %v512_v61 = vld [vmem:[#allocation10 + $0xb0] sm:$0xff]  ;;  %v519_v63 = vld [vmem:[#allocation10 + $0xe8] sm:$0xff]  ;;  %v517_v0 = vld [vmem:[#allocation10 + $0xd8] sm:$0xff]  ;;  %v2300_v2 = vpack.c.bf16 %v510_v58, %v506_v57 }
  0x97   : > { %1479 = vmatprep.subr.bf16.mxu1 %v2281_v46  ;;  %620 = vmatprep.mubr.f32.mxu0 %v2039_v9  ;;  %v521_v1 = vld [vmem:[#allocation10 + $0xf8] sm:$0xff]  ;;  %v2304_v3 = vpack.c.bf16 %v512_v61, %v508_v59  ;;  %v2306_v4 = vpack.c.bf16 %v519_v63, %v515_v62  ;;  %v514_v5 = vld [vmem:[#allocation10 + $0xc0] sm:$0xff]  ;;  %v516_v7 = vld [vmem:[#allocation10 + $0xd0] sm:$0xff] }
  0x98   : > { %691 = vmatprep.mubr.f32.mxu1 %v2039_v9  ;;  %v518_v6 = vld [vmem:[#allocation10 + $0xe0] sm:$0xff]  ;;  %v2309_v8 = vpack.c.bf16 %v521_v1, %v517_v0  ;;  %v520_v10 = vld [vmem:[#allocation10 + $0xf0] sm:$0xff]  ;;  %v523_v11 = vld [vmem:[#allocation10 + $0x108] sm:$0xff] }
  0x99   : > { %1449 = vmatpush1.bf16.msra.mxu0 %v2286_v53  ;;  %v527_v12 = vld [vmem:[#allocation10 + $0x128] sm:$0xff]  ;;  %v525_v13 = vld [vmem:[#allocation10 + $0x118] sm:$0xff]  ;;  %v2312_v15 = vpack.c.bf16 %v518_v6, %v514_v5  ;;  %v2316_v16 = vpack.c.bf16 %v520_v10, %v516_v7  ;;  %v522_v18 = vld [vmem:[#allocation10 + $0x100] sm:$0xff] }
  0x9a   : > { %1481 = vmatpush1.bf16.msra.mxu1 %v2290_v55  ;;  %1451 = vmatprep.subr.bf16.mxu0 %v2292_v56  ;;  %v529_v14 = vld [vmem:[#allocation10 + $0x138] sm:$0xff]  ;;  %v2318_v17 = vpack.c.bf16 %v527_v12, %v523_v11  ;;  %v526_v19 = vld [vmem:[#allocation10 + $0x120] sm:$0xff]  ;;  %v524_v20 = vld [vmem:[#allocation10 + $0x110] sm:$0xff] }
  0x9b   : > { %1483 = vmatprep.subr.bf16.mxu1 %v2295_v60  ;;  %v2321_v21 = vpack.c.bf16 %v529_v14, %v525_v13  ;;  %v528_v22 = vld [vmem:[#allocation10 + $0x130] sm:$0xff]  ;;  %v531_v23 = vld [vmem:[#allocation10 + $0x148] sm:$0xff]  ;;  %v533_v25 = vld [vmem:[#allocation10 + $0x158] sm:$0xff]  ;;  %v2324_v27 = vpack.c.bf16 %v526_v19, %v522_v18 }
  0x9c   : > { %v535_v24 = vld [vmem:[#allocation10 + $0x168] sm:$0xff]  ;;  %v537_v26 = vld [vmem:[#allocation10 + $0x178] sm:$0xff]  ;;  %v2328_v28 = vpack.c.bf16 %v528_v22, %v524_v20  ;;  %v530_v30 = vld [vmem:[#allocation10 + $0x140] sm:$0xff]  ;;  %v324_v20 = vlaneseq }
  0x9d   : > { %1453 = vmatpush1.bf16.msra.mxu0 %v2300_v2  ;;  %v2330_v29 = vpack.c.bf16 %v535_v24, %v531_v23  ;;  %v534_v31 = vld [vmem:[#allocation10 + $0x160] sm:$0xff]  ;;  %v532_v34 = vld [vmem:[#allocation10 + $0x150] sm:$0xff]  ;;  %v2333_v35 = vpack.c.bf16 %v537_v26, %v533_v25  ;;  %v539_v38 = vld [vmem:[#allocation10 + $0x188] sm:$0xff] }
  0x9e   : > { %1485 = vmatpush1.bf16.msra.mxu1 %v2304_v3  ;;  %1455 = vmatprep.subr.bf16.mxu0 %v2306_v4  ;;  %v536_v36 = vld [vmem:[#allocation10 + $0x170] sm:$0xff]  ;;  %v543_v39 = vld [vmem:[#allocation10 + $0x1a8] sm:$0xff]  ;;  %v541_v40 = vld [vmem:[#allocation10 + $0x198] sm:$0xff]  ;;  %v2336_v44 = vpack.c.bf16 %v534_v31, %v530_v30  ;;  %v325_v22 = vshrl.u32 %v324_v20, 7 }
  0x9f   : > { %1487 = vmatprep.subr.bf16.mxu1 %v2309_v8  ;;  %v545_v43 = vld [vmem:[#allocation10 + $0x1b8] sm:$0xff]  ;;  %v2340_v45 = vpack.c.bf16 %v536_v36, %v532_v34  ;;  %v2342_v47 = vpack.c.bf16 %v543_v39, %v539_v38  ;;  %v538_v48 = vld [vmem:[#allocation10 + $0x180] sm:$0xff]  ;;  %v540_v50 = vld [vmem:[#allocation10 + $0x190] sm:$0xff] }
  0xa0   : > { %v542_v49 = vld [vmem:[#allocation10 + $0x1a0] sm:$0xff]  ;;  %v2345_v51 = vpack.c.bf16 %v545_v43, %v541_v40  ;;  %v544_v52 = vld [vmem:[#allocation10 + $0x1b0] sm:$0xff]  ;;  %v547_v54 = vld [vmem:[#allocation10 + $0x1c8] sm:$0xff]  ;;  %v326_v23 = vsub.s32 0, %v325_v22  ;;  %v330_v25 = vsub.s32 1, %v325_v22  ;;  %v338_v31 = vsub.s32 3, %v325_v22 }
  0xa1   : > { %1457 = vmatpush1.bf16.msra.mxu0 %v2312_v15  ;;  %v551_v57 = vld [vmem:[#allocation10 + $0x1e8] sm:$0xff]  ;;  %v549_v58 = vld [vmem:[#allocation10 + $0x1d8] sm:$0xff]  ;;  %v2348_v61 = vpack.c.bf16 %v542_v49, %v538_v48  ;;  %v2352_v62 = vpack.c.bf16 %v544_v52, %v540_v50  ;;  %v546_v0 = vld [vmem:[#allocation10 + $0x1c0] sm:$0xff]  ;;  %v334_v52 = vsub.s32 2, %v325_v22 }
  0xa2   : > { %1489 = vmatpush1.bf16.msra.mxu1 %v2316_v16  ;;  %1459 = vmatprep.subr.bf16.mxu0 %v2318_v17  ;;  %v553_v59 = vld [vmem:[#allocation10 + $0x1f8] sm:$0xff]  ;;  %v2354_v63 = vpack.c.bf16 %v551_v57, %v547_v54  ;;  %v550_v1 = vld [vmem:[#allocation10 + $0x1e0] sm:$0xff]  ;;  %v548_v6 = vld [vmem:[#allocation10 + $0x1d0] sm:$0xff] }
  0xa3   : > { %1491 = vmatprep.subr.bf16.mxu1 %v2321_v21  ;;  %v2357_v5 = vpack.c.bf16 %v553_v59, %v549_v58  ;;  %v552_v7 = vld [vmem:[#allocation10 + $0x1f0] sm:$0xff]  ;;  %v2360_v10 = vpack.c.bf16 %v550_v1, %v546_v0  ;;  %v554_v12 = vld [vmem:[#allocation2] sm:$0x3] }
  0xa4   : > { %v2364_v11 = vpack.c.bf16 %v552_v7, %v548_v6  ;;  %v322_v24 = vld [vmem:[%s2548_s5] sm:$0xf] }
  0xa5   : > { %1461 = vmatpush1.bf16.msra.mxu0 %v2324_v27  ;;  %v327_v26 = vrot.slane %v322_v24, %v326_v23  ;;  %v331_v30 = vrot.slane %v322_v24, %v330_v25  ;;  %v339_v48 = vrot.slane %v322_v24, %v338_v31  ;;  %v335_v59 = vrot.slane %v322_v24, %v334_v52  ;;  %v555_v23 = vld [vmem:[#allocation3] sm:$0x3] }
  0xa6   : > { %1493 = vmatpush1.bf16.msra.mxu1 %v2328_v28  ;;  %1463 = vmatprep.subr.bf16.mxu0 %v2330_v29 }
  0xa7   : > { %1495 = vmatprep.subr.bf16.mxu1 %v2333_v35 }
  0xa9   : > { %1465 = vmatpush1.bf16.msra.mxu0 %v2336_v44 }
  0xaa   : > { %1497 = vmatpush1.bf16.msra.mxu1 %v2340_v45  ;;  %1467 = vmatprep.subr.bf16.mxu0 %v2342_v47 }
  0xab   : > { %1499 = vmatprep.subr.bf16.mxu1 %v2345_v51 }
  0xad   : > { %1469 = vmatpush1.bf16.msra.mxu0 %v2348_v61 }
  0xae   : > { %1501 = vmatpush1.bf16.msra.mxu1 %v2352_v62  ;;  %1471 = vmatprep.subr.bf16.mxu0 %v2354_v63 }
  0xaf   : > { %1503 = vmatprep.subr.bf16.mxu1 %v2357_v5 }
  0xb1   : > { %1473 = vmatpush1.bf16.msra.mxu0 %v2360_v10 }
  0xb2   : > { %1505 = vmatpush1.bf16.msra.mxu1 %v2364_v11  ;;  %1507 = vmatprep.subr.bf16.mxu0 %v2269_v32 }
  0xb3   : > { %1539 = vmatprep.subr.bf16.mxu1 %v2271_v33 }
  0xb4   : > { %621 = vmatmul.mubr.f32.vlgmr.msra.gmra.mrb[2].mxu0 %v554_v12 }
  0xb5   : > { %692 = vmatmul.mubr.f32.vlgmr.msra.gmra.mrb[2].mxu1 %v554_v12  ;;  %1509 = vmatpush1.bf16.msra.mxu0 %v2273_v37 }
  0xb6   : > { %1541 = vmatpush1.bf16.msra.mxu1 %v2276_v41  ;;  %1511 = vmatprep.subr.bf16.mxu0 %v2278_v42 }
  0xb7   : > { %1543 = vmatprep.subr.bf16.mxu1 %v2281_v46  ;;  %790 = vmatprep.mubr.f32.mxu0 %v2039_v9 }
  0xb8   : > { %861 = vmatprep.mubr.f32.mxu1 %v2039_v9 }
  0xb9   : > { %1513 = vmatpush1.bf16.msra.mxu0 %v2286_v53 }
  0xba   : > { %1545 = vmatpush1.bf16.msra.mxu1 %v2290_v55  ;;  %1515 = vmatprep.subr.bf16.mxu0 %v2292_v56 }
  0xbb   : > { %1547 = vmatprep.subr.bf16.mxu1 %v2295_v60 }
  0xbd   : > { %1517 = vmatpush1.bf16.msra.mxu0 %v2300_v2 }
  0xbe   : > { %1549 = vmatpush1.bf16.msra.mxu1 %v2304_v3  ;;  %1519 = vmatprep.subr.bf16.mxu0 %v2306_v4 }
  0xbf   : > { %1551 = vmatprep.subr.bf16.mxu1 %v2309_v8 }
  0xc1   : > { %1521 = vmatpush1.bf16.msra.mxu0 %v2312_v15 }
  0xc2   : > { %1553 = vmatpush1.bf16.msra.mxu1 %v2316_v16  ;;  %1523 = vmatprep.subr.bf16.mxu0 %v2318_v17 }
  0xc3   : > { %1555 = vmatprep.subr.bf16.mxu1 %v2321_v21 }
  0xc5   : > { %1525 = vmatpush1.bf16.msra.mxu0 %v2324_v27 }
  0xc6   : > { %1557 = vmatpush1.bf16.msra.mxu1 %v2328_v28  ;;  %1527 = vmatprep.subr.bf16.mxu0 %v2330_v29 }
  0xc7   : > { %1559 = vmatprep.subr.bf16.mxu1 %v2333_v35 }
  0xc9   : > { %1529 = vmatpush1.bf16.msra.mxu0 %v2336_v44 }
  0xca   : > { %1561 = vmatpush1.bf16.msra.mxu1 %v2340_v45  ;;  %1531 = vmatprep.subr.bf16.mxu0 %v2342_v47 }
  0xcb   : > { %1563 = vmatprep.subr.bf16.mxu1 %v2345_v51 }
  0xcd   : > { %1533 = vmatpush1.bf16.msra.mxu0 %v2348_v61 }
  0xce   : > { %1565 = vmatpush1.bf16.msra.mxu1 %v2352_v62  ;;  %1535 = vmatprep.subr.bf16.mxu0 %v2354_v63 }
  0xcf   : > { %1567 = vmatprep.subr.bf16.mxu1 %v2357_v5 }
  0xd1   : > { %1537 = vmatpush1.bf16.msra.mxu0 %v2360_v10 }
  0xd2   : > { %1569 = vmatpush1.bf16.msra.mxu1 %v2364_v11  ;;  %1571 = vmatprep.subr.bf16.mxu0 %v2269_v32 }
  0xd3   : > { %1603 = vmatprep.subr.bf16.mxu1 %v2271_v33 }
 0x167   : > { %v414_v13 = vpop.f32.mrb[0].mxu0 }
 0x168   : > { %v416_v14 = vpop.f32.mrb[1].mxu0  ;;  %v485_v18 = vpop.f32.mrb[0].mxu1  ;;  %v2408_v34 = vadd.f32 %v414_v13, %v327_v26 }
 0x169   : > { %v487_v19 = vpop.f32.mrb[1].mxu1  ;;  %v2410_v36 = vadd.f32 %v416_v14, %v331_v30  ;;  %v2417_v1 = vadd.f32 %v485_v18, %v335_v59 }
 0x16a   : > { %v2414_v58 = vadd.f32 %v487_v19, %v339_v48 }
 0x187   : > { %v622_v38 = vpop.f32.mrb[2].mxu0 }
 0x188   : > { %v698_v39 = vadd.f32 %v622_v38, %v2408_v34  ;;  %v693_v40 = vpop.f32.mrb[2].mxu1  ;;  %v624_v43 = vpop.f32.mrb[3].mxu0 }
 0x189   : > { %v699_v49 = vadd.f32 %v624_v43, %v2410_v36  ;;  %v695_v50 = vpop.f32.mrb[3].mxu1  ;;  %v700_v7 = vadd.f32 %v693_v40, %v2417_v1 }
 0x18a   : > { %v1409_v54 = vmul.f32 -1.442695, %v698_v39  ;;  %v701_v0 = vadd.f32 %v695_v50, %v2414_v58 }
 0x18b   : > { %v1410_v57 = vmul.f32 -1.442695, %v699_v49 }
 0x18c   : > { %1779 = vpow2.f32 %v1409_v54  ;;  %v1411_v6 = vmul.f32 -1.442695, %v701_v0 }
 0x18d   : > { %1781 = vpow2.f32 %v1410_v57 }
 0x18e   : > { %1783 = vpow2.f32 %v1411_v6 }
 0x18f   : > { %1785 = vtanh.f32 %v700_v7 }
 0x196   : > { %v1780_v12 = vpop.eup %1779 }
 0x197   : > { %v1782_v13 = vpop.eup %1781  ;;  %v705_v14 = vadd.f32 1.0, %v1780_v12 }
 0x198   : > { %v711_v20 = vadd.f32 1.0, %v1782_v13  ;;  %v1784_v22 = vpop.eup %1783 }
 0x199   : > { %1787 = vrcp.f32 %v705_v14  ;;  %v1786_v19 = vpop.eup %1785  ;;  %v718_v30 = vadd.f32 1.0, %v1784_v22 }
 0x19a   : > { %1789 = vrcp.f32 %v711_v20 }
 0x19b   : > { %1791 = vrcp.f32 %v718_v30 }
 0x1a3   : > { %v1788_v25 = vpop.eup %1787 }
 0x1a4   : > { %v1790_v24 = vpop.eup %1789  ;;  %v722_v26 = vmul.f32 %v1788_v25, %v1786_v19 }
 0x1a5   : > { %v721_v18 = vmul.f32 %v1790_v24, %v555_v23  ;;  %v1792_v38 = vpop.eup %1791 }
 0x1a7   : > { %v2420_v31 = vadd.f32 %v722_v26, %v721_v18 }
 0x1a9   : > { %1793 = vtanh.f32 %v2420_v31  ;;  %v904_v26 = vrot.slane %v2420_v31, 6 }
 0x1b3   : > { %v1794_v39 = vpop.eup %1793 }
 0x1b4   : > { %v725_v40 = vmul.f32 %v1794_v39, %v1792_v38 }
 0x1b6   : > { %791 = vmatmul.mubr.f32.vlgmr.msra.gmra.mrb[4].mxu0 %v725_v40  ;;  %862 = vmatmul.mubr.f32.vlgmr.msra.gmra.mrb[4].mxu1 %v725_v40 }
 0x1b7   : > { %1573 = vmatpush1.bf16.msra.mxu0 %v2273_v37  ;;  %1605 = vmatpush1.bf16.msra.mxu1 %v2276_v41 }
 0x1b8   : > { %1575 = vmatprep.subr.bf16.mxu0 %v2278_v42  ;;  %1607 = vmatprep.subr.bf16.mxu1 %v2281_v46 }
 0x1b9   : > { %978 = vmatprep.mubr.f32.mxu0 %v2039_v9  ;;  %1049 = vmatprep.mubr.f32.mxu1 %v2039_v9 }
 0x1bb   : > { %1577 = vmatpush1.bf16.msra.mxu0 %v2286_v53  ;;  %1609 = vmatpush1.bf16.msra.mxu1 %v2290_v55 }
 0x1bc   : > { %1579 = vmatprep.subr.bf16.mxu0 %v2292_v56  ;;  %1611 = vmatprep.subr.bf16.mxu1 %v2295_v60 }
 0x1bf   : > { %1581 = vmatpush1.bf16.msra.mxu0 %v2300_v2  ;;  %1613 = vmatpush1.bf16.msra.mxu1 %v2304_v3 }
 0x1c0   : > { %1583 = vmatprep.subr.bf16.mxu0 %v2306_v4  ;;  %1615 = vmatprep.subr.bf16.mxu1 %v2309_v8 }
 0x1c3   : > { %1585 = vmatpush1.bf16.msra.mxu0 %v2312_v15  ;;  %1617 = vmatpush1.bf16.msra.mxu1 %v2316_v16 }
 0x1c4   : > { %1587 = vmatprep.subr.bf16.mxu0 %v2318_v17  ;;  %1619 = vmatprep.subr.bf16.mxu1 %v2321_v21 }
 0x1c7   : > { %1589 = vmatpush1.bf16.msra.mxu0 %v2324_v27  ;;  %1621 = vmatpush1.bf16.msra.mxu1 %v2328_v28 }
 0x1c8   : > { %1591 = vmatprep.subr.bf16.mxu0 %v2330_v29  ;;  %1623 = vmatprep.subr.bf16.mxu1 %v2333_v35 }
 0x1cb   : > { %1593 = vmatpush1.bf16.msra.mxu0 %v2336_v44  ;;  %1625 = vmatpush1.bf16.msra.mxu1 %v2340_v45 }
 0x1cc   : > { %1595 = vmatprep.subr.bf16.mxu0 %v2342_v47  ;;  %1627 = vmatprep.subr.bf16.mxu1 %v2345_v51 }
 0x1cf   : > { %1597 = vmatpush1.bf16.msra.mxu0 %v2348_v61  ;;  %1629 = vmatpush1.bf16.msra.mxu1 %v2352_v62 }
 0x1d0   : > { %1599 = vmatprep.subr.bf16.mxu0 %v2354_v63  ;;  %1631 = vmatprep.subr.bf16.mxu1 %v2357_v5 }
 0x1d3   : > { %1601 = vmatpush1.bf16.msra.mxu0 %v2360_v10  ;;  %1633 = vmatpush1.bf16.msra.mxu1 %v2364_v11 }
 0x1d4   : > { %1635 = vmatprep.subr.bf16.mxu0 %v2269_v32  ;;  %1667 = vmatprep.subr.bf16.mxu1 %v2271_v33 }
 0x289   : > { %v792_v43 = vpop.f32.mrb[4].mxu0  ;;  %v863_v48 = vpop.f32.mrb[4].mxu1 }
 0x28a   : > { %v872_v49 = vrot.slane %v792_v43, 6  ;;  %v794_v50 = vpop.f32.mrb[5].mxu0  ;;  %v865_v52 = vpop.f32.mrb[5].mxu1  ;;  %v874_v32 = vrot.slane %v863_v48, 6 }
 0x28b   : > { %v873_v54 = vrot.slane %v794_v50, 6  ;;  %v875_v7 = vrot.slane %v865_v52, 6 }
 0x28c   : > { %v880_v57 = vadd.f32 %v872_v49, %v2408_v34  ;;  %v882_v33 = vadd.f32 %v874_v32, %v2417_v1 }
 0x28d   : > { %v881_v59 = vadd.f32 %v873_v54, %v2410_v36  ;;  %v883_v12 = vadd.f32 %v875_v7, %v2414_v58 }
 0x28e   : > { %v1412_v0 = vmul.f32 -1.442695, %v880_v57 }
 0x28f   : > { %v1413_v6 = vmul.f32 -1.442695, %v881_v59  ;;  %v1414_v13 = vmul.f32 -1.442695, %v883_v12 }
 0x290   : > { %1795 = vpow2.f32 %v1412_v0 }
 0x291   : > { %1797 = vpow2.f32 %v1413_v6 }
 0x292   : > { %1799 = vpow2.f32 %v1414_v13 }
 0x293   : > { %1801 = vtanh.f32 %v882_v33 }
 0x29a   : > { %v1796_v14 = vpop.eup %1795 }
 0x29b   : > { %v1798_v20 = vpop.eup %1797  ;;  %v887_v22 = vadd.f32 1.0, %v1796_v14 }
 0x29c   : > { %v893_v19 = vadd.f32 1.0, %v1798_v20  ;;  %v1800_v23 = vpop.eup %1799 }
 0x29d   : > { %1803 = vrcp.f32 %v887_v22  ;;  %v1802_v25 = vpop.eup %1801  ;;  %v900_v38 = vadd.f32 1.0, %v1800_v23 }
 0x29e   : > { %1805 = vrcp.f32 %v893_v19 }
 0x29f   : > { %1807 = vrcp.f32 %v900_v38 }
 0x2a7   : > { %v1804_v24 = vpop.eup %1803 }
 0x2a8   : > { %v1806_v30 = vpop.eup %1805  ;;  %v907_v18 = vmul.f32 %v1804_v24, %v1802_v25 }
 0x2a9   : > { %v906_v39 = vmul.f32 %v1806_v30, %v904_v26  ;;  %v1808_v43 = vpop.eup %1807 }
 0x2ab   : > { %v2462_v40 = vadd.f32 %v907_v18, %v906_v39 }
 0x2ad   : > { %1809 = vtanh.f32 %v2462_v40 }
 0x2b7   : > { %v1810_v48 = vpop.eup %1809 }
 0x2b8   : > { %v910_v49 = vmul.f32 %v1810_v48, %v1808_v43 }
 0x2ba   : > { %v912_v50 = vrot.slane %v910_v49, 2 }
 0x2bc   : > { %979 = vmatmul.mubr.f32.vlgmr.msra.gmra.mrb[6].mxu0 %v912_v50  ;;  %1050 = vmatmul.mubr.f32.vlgmr.msra.gmra.mrb[6].mxu1 %v912_v50 }
 0x2bd   : > { %1637 = vmatpush1.bf16.msra.mxu0 %v2273_v37  ;;  %1669 = vmatpush1.bf16.msra.mxu1 %v2276_v41 }
 0x2be   : > { %1639 = vmatprep.subr.bf16.mxu0 %v2278_v42  ;;  %1671 = vmatprep.subr.bf16.mxu1 %v2281_v46 }
 0x2bf   : > { %1166 = vmatprep.mubr.f32.mxu0 %v2039_v9  ;;  %1237 = vmatprep.mubr.f32.mxu1 %v2039_v9 }
 0x2c1   : > { %1641 = vmatpush1.bf16.msra.mxu0 %v2286_v53  ;;  %1673 = vmatpush1.bf16.msra.mxu1 %v2290_v55 }
 0x2c2   : > { %1643 = vmatprep.subr.bf16.mxu0 %v2292_v56  ;;  %1675 = vmatprep.subr.bf16.mxu1 %v2295_v60 }
 0x2c5   : > { %1645 = vmatpush1.bf16.msra.mxu0 %v2300_v2  ;;  %1677 = vmatpush1.bf16.msra.mxu1 %v2304_v3 }
 0x2c6   : > { %1647 = vmatprep.subr.bf16.mxu0 %v2306_v4  ;;  %1679 = vmatprep.subr.bf16.mxu1 %v2309_v8 }
 0x2c9   : > { %1649 = vmatpush1.bf16.msra.mxu0 %v2312_v15  ;;  %1681 = vmatpush1.bf16.msra.mxu1 %v2316_v16 }
 0x2ca   : > { %1651 = vmatprep.subr.bf16.mxu0 %v2318_v17  ;;  %1683 = vmatprep.subr.bf16.mxu1 %v2321_v21 }
 0x2cd   : > { %1653 = vmatpush1.bf16.msra.mxu0 %v2324_v27  ;;  %1685 = vmatpush1.bf16.msra.mxu1 %v2328_v28 }
 0x2ce   : > { %1655 = vmatprep.subr.bf16.mxu0 %v2330_v29  ;;  %1687 = vmatprep.subr.bf16.mxu1 %v2333_v35 }
 0x2d1   : > { %1657 = vmatpush1.bf16.msra.mxu0 %v2336_v44  ;;  %1689 = vmatpush1.bf16.msra.mxu1 %v2340_v45  ;;  %v1092_v45 = vrot.slane %v2462_v40, 6 }
 0x2d2   : > { %1659 = vmatprep.subr.bf16.mxu0 %v2342_v47  ;;  %1691 = vmatprep.subr.bf16.mxu1 %v2345_v51 }
 0x2d5   : > { %1661 = vmatpush1.bf16.msra.mxu0 %v2348_v61  ;;  %1693 = vmatpush1.bf16.msra.mxu1 %v2352_v62 }
 0x2d6   : > { %1663 = vmatprep.subr.bf16.mxu0 %v2354_v63  ;;  %1695 = vmatprep.subr.bf16.mxu1 %v2357_v5 }
 0x2d9   : > { %1665 = vmatpush1.bf16.msra.mxu0 %v2360_v10  ;;  %1697 = vmatpush1.bf16.msra.mxu1 %v2364_v11 }
 0x38f   : > { %v980_v9 = vpop.f32.mrb[6].mxu0  ;;  %v1051_v37 = vpop.f32.mrb[6].mxu1 }
 0x390   : > { %v1060_v41 = vrot.slane %v980_v9, 4  ;;  %v982_v42 = vpop.f32.mrb[7].mxu0  ;;  %v1053_v46 = vpop.f32.mrb[7].mxu1  ;;  %v1062_v8 = vrot.slane %v1051_v37, 4 }
 0x391   : > { %v1061_v53 = vrot.slane %v982_v42, 4  ;;  %v1063_v3 = vrot.slane %v1053_v46, 4 }
 0x392   : > { %v1068_v55 = vadd.f32 %v1060_v41, %v2408_v34  ;;  %v1070_v16 = vadd.f32 %v1062_v8, %v2417_v1 }
 0x393   : > { %v1069_v56 = vadd.f32 %v1061_v53, %v2410_v36  ;;  %v1071_v4 = vadd.f32 %v1063_v3, %v2414_v58 }
 0x394   : > { %v1415_v60 = vmul.f32 -1.442695, %v1068_v55 }
 0x395   : > { %v1416_v2 = vmul.f32 -1.442695, %v1069_v56  ;;  %v1417_v15 = vmul.f32 -1.442695, %v1071_v4 }
 0x396   : > { %1811 = vpow2.f32 %v1415_v60 }
 0x397   : > { %1813 = vpow2.f32 %v1416_v2 }
 0x398   : > { %1815 = vpow2.f32 %v1417_v15 }
 0x399   : > { %1817 = vtanh.f32 %v1070_v16 }
 0x3a0   : > { %v1812_v17 = vpop.eup %1811 }
 0x3a1   : > { %v1814_v21 = vpop.eup %1813  ;;  %v1075_v27 = vadd.f32 1.0, %v1812_v17 }
 0x3a2   : > { %v1081_v28 = vadd.f32 1.0, %v1814_v21  ;;  %v1816_v29 = vpop.eup %1815 }
 0x3a3   : > { %1819 = vrcp.f32 %v1075_v27  ;;  %v1818_v35 = vpop.eup %1817  ;;  %v1088_v61 = vadd.f32 1.0, %v1816_v29 }
 0x3a4   : > { %1821 = vrcp.f32 %v1081_v28 }
 0x3a5   : > { %1823 = vrcp.f32 %v1088_v61 }
 0x3ad   : > { %v1820_v44 = vpop.eup %1819 }
 0x3ae   : > { %v1822_v47 = vpop.eup %1821  ;;  %v1095_v51 = vmul.f32 %v1820_v44, %v1818_v35 }
 0x3af   : > { %v1094_v62 = vmul.f32 %v1822_v47, %v1092_v45  ;;  %v1824_v5 = vpop.eup %1823 }
 0x3b1   : > { %v1096_v63 = vadd.f32 %v1095_v51, %v1094_v62 }
 0x3b3   : > { %1825 = vtanh.f32 %v1096_v63  ;;  %v1280_v18 = vrot.slane %v1096_v63, 6 }
 0x3bd   : > { %v1826_v10 = vpop.eup %1825 }
 0x3be   : > { %v1098_v11 = vmul.f32 %v1826_v10, %v1824_v5 }
 0x3c0   : > { %v1100_v31 = vrot.slane %v1098_v11, 4 }
 0x3c2   : > { %1167 = vmatmul.mubr.f32.vlgmr.msra.gmra.mrb[8].mxu0 %v1100_v31  ;;  %1238 = vmatmul.mubr.f32.vlgmr.msra.gmra.mrb[8].mxu1 %v1100_v31 }
 0x495   : > { %v1168_v52 = vpop.f32.mrb[8].mxu0  ;;  %v1239_v54 = vpop.f32.mrb[8].mxu1 }
 0x496   : > { %v1248_v57 = vrot.slane %v1168_v52, 2  ;;  %v1170_v59 = vpop.f32.mrb[9].mxu0  ;;  %v1241_v0 = vpop.f32.mrb[9].mxu1  ;;  %v1250_v20 = vrot.slane %v1239_v54, 2 }
 0x497   : > { %v1249_v6 = vrot.slane %v1170_v59, 2  ;;  %v1251_v33 = vrot.slane %v1241_v0, 2 }
 0x498   : > { %v1256_v7 = vadd.f32 %v1248_v57, %v2408_v34  ;;  %v1258_v19 = vadd.f32 %v1250_v20, %v2417_v1 }
 0x499   : > { %v1257_v12 = vadd.f32 %v1249_v6, %v2410_v36  ;;  %v1259_v14 = vadd.f32 %v1251_v33, %v2414_v58 }
 0x49a   : > { %v1418_v32 = vmul.f32 -1.442695, %v1256_v7 }
 0x49b   : > { %v1419_v13 = vmul.f32 -1.442695, %v1257_v12  ;;  %v1420_v22 = vmul.f32 -1.442695, %v1259_v14 }
 0x49c   : > { %1827 = vpow2.f32 %v1418_v32 }
 0x49d   : > { %1829 = vpow2.f32 %v1419_v13 }
 0x49e   : > { %1831 = vpow2.f32 %v1420_v22 }
 0x49f   : > { %1833 = vtanh.f32 %v1258_v19 }
 0x4a6   : > { %v1828_v23 = vpop.eup %1827 }
 0x4a7   : > { %v1830_v25 = vpop.eup %1829  ;;  %v1263_v24 = vadd.f32 1.0, %v1828_v23 }
 0x4a8   : > { %v1269_v26 = vadd.f32 1.0, %v1830_v25  ;;  %v1832_v34 = vpop.eup %1831 }
 0x4a9   : > { %1835 = vrcp.f32 %v1263_v24  ;;  %v1834_v36 = vpop.eup %1833  ;;  %v1276_v40 = vadd.f32 1.0, %v1832_v34 }
 0x4aa   : > { %1837 = vrcp.f32 %v1269_v26 }
 0x4ab   : > { %1839 = vrcp.f32 %v1276_v40 }
 0x4b3   : > { %v1836_v30 = vpop.eup %1835 }
 0x4b4   : > { %v1838_v38 = vpop.eup %1837  ;;  %v1283_v39 = vmul.f32 %v1836_v30, %v1834_v36 }
 0x4b5   : > { %v1282_v58 = vmul.f32 %v1838_v38, %v1280_v18  ;;  %v1840_v1 = vpop.eup %1839 }
 0x4b7   : > { %v1284_v43 = vadd.f32 %v1283_v39, %v1282_v58 }
 0x4b9   : > { %1841 = vtanh.f32 %v1284_v43  ;;  %1288 = vst [vmem:[#allocation3 - $0x6] sm:$0xc0] %v1284_v43 }
 0x4c0   : > { %1292 = sbr.rel (%p1421_p11) target bundleno = 1500 (0x5dc), region = 68 }
 0x4c3   : > { %v1842_v48 = vpop.eup %1841 }
 0x4c4   : > { %v1286_v49 = vmul.f32 %v1842_v48, %v1840_v1 }
 0x4c6   : > { %1287 = vst [vmem:[#allocation2 - $0x6] sm:$0xc0] %v1286_v49  ;;  %1294 = vrot.lane.b32.xlu0 (!%p1421_p11), %v1286_v49, %s2040_s17 }
 0x538   : > { %v1295_v50 = vpop.permute.xlu0 %1294 }
 0x539   : > { %v1297_v9 = vsub.f32 %v1286_v49, %v1295_v50 }
 0x53b   : > { %v1298_v37 = vand.u32 2147483647, %v1297_v9 }
 0x53d   : > { %v1300_v41 = vsel %vm1299_vm1, %v1298_v37, 0.0 }
 0x53e   : > { %1301 = vadd.xlane.f32.xlu0 %v1300_v41 }
 0x5cb   : > { %v1302_v42 = vpop.xlane.xlu0 %1301 }
 0x5cc   : > { %v1303_v46 = vsub.f32 0.0, %v1302_v42 }
 0x5ce   : > { %v1304_v53 = vmul.f32 1.442695, %v1303_v46 }
 0x5d0   : > { %1843 = vpow2.f32 %v1304_v53 }
 0x5da   : > { %v1844_v55 = vpop.eup %1843 }
 0x5db   : > { %1306 = vst [vmem:[#allocation12 - $0x6] sm:$0xc0] %v1844_v55 }
 0x5dc PF: > { %p1737_p1 = scmp.eq.s32.totalorder %s2096_s25, 1  ;;  %s2041_s24 = smov [#allocation12]  }
 0x5dd   : > { %s1314_s12 = sshll.u32 %s2041_s24, 4  ;;  %s1315_s12 = int_to_ptr.vmem [resolvable:$true] %s1314_s12 }
 0x5de   : > { %s1959_s13 = scalar_lea.vmem %s1315_s12, 32  ;;  %p1966_p0 = scmp.lt.s32.totalorder %s1315_s12, %s1315_s12 }
 0x5df   : > { %p1960_p4 = scmp.ne.s32.totalorder %s1315_s12, %s1959_s13  ;;  %p1967_p2 = scmp.lt.s32.totalorder %s1959_s13, %s1959_s13 }
 0x5e1   : > { %p1961_p5 = pnand %p1960_p4, %p1737_p1  ;;  %p1968_p13 = por %p1967_p2, %p1966_p0 }
 0x5e3   : > { %p1962_p12 = pneg %p1961_p5 }
 0x5e5   : > { %p1969_p6 = pnand %p1968_p13, %p1962_p12 }
 0x5e7   : > { %1972 = shalt.err (!%p1969_p6)
}
 0x5e8   : > { %s1973_s29 = scalar_lea.hbm %s2549_s6, 32 }
 0x5e9   : > { %p1974_p3 = scmp.ne.s32.totalorder %s2549_s6, %s1973_s29  ;;  %p1979_p10 = scmp.lt.u32.totalorder %s1973_s29, %s2549_s6 }
 0x5eb   : > { %p1975_p8 = pnand %p1974_p3, %p1737_p1 }
 0x5ed   : > { %p1976_p7 = pneg %p1975_p8 }
 0x5ef   : > { %p1981_p9 = pnand %p1979_p10, %p1976_p7 }
 0x5f1   : > { %1984 = shalt.err (!%p1981_p9)
}
 0x5f2   : > { %1713 = dma.vmem_to_hbm [thread:$0]  (%p1737_p1), %s1315_s12, 32, %s2549_s6, [#allocation6]  }
 0x5f3   : > { %2014 = dma.done.wait (%p1737_p1), [#allocation6], 32  }
 0x5f4   : > { %2016 = vsyncadd (%p1737_p1), [#allocation6], 4294967264 }
 0x5f5 PF: > { %p19_p11 = scmp.ge.s32.totalorder %s2192_s16, 4   ;;  %s2565_s21 = smov %s2023_s22 }
 0x5f6   : > { %s2566_s22 = smov %s2027_s23  ;;  %s2567_s23 = smov %s2202_s8 }
 0x5f7   : > { %s2568_s24 = smov %s2192_s16  ;;  %21 = sbr.rel (!%p19_p11) target bundleno = 6 (0x6), region = 101 }
 0x5fe   :  { %1327 = vsyncpa [#allocation5], 1 }
 0x5ff   :  { %1329 = vsyncpa [#allocation5 + $0x1], 1 }
 0x600   :  { %1330 = vsyncpa [#allocation8], 1 }
 0x601   :  { %1331 = vsyncpa [#allocation11], 1 }
 0x602   :  { %1332 = vsyncpa [#allocation6], 1 }
 0x603   :  { %1334 = vsyncpa [#allocation6 + $0x1], 1 }

</bundles_post_ra>
